<compile_context>
chip_gen: v6e
topology: v6e:2x2x1
jax: 0.10.0
libtpu: 0.0.40
codegen_flags: <defaults>
</compile_context>

<pallas_src>
import functools

import jax
import jax.numpy as jnp
from jax.experimental import pallas as pl
from jax.experimental.pallas import tpu as pltpu


def _round_up(x, m):
    return ((x + m - 1) // m) * m


def _cdiv(a, b):
    return -(-a // b)


def _label_head_kernel(hs_ref, w_ref, b_ref, out_ref, acc_ref, max_ref, *,
                       inv_num_layers):
    """Streaming layer-stack mean/max + fused Linear(2H -> 1).

    hs_ref:  [1, TILE_M, H] (VMEM)   one layer slab of the current M tile (native dtype)
    w_ref:   [H, 2]         (VMEM)   col 0: mean-path weights, col 1: max-path weights
    b_ref:   [1, 1]  f32    (SMEM)   label_fc bias
    out_ref: [TILE_M, 1] f32 (VMEM)  written only on the last layer step
    acc_ref: [TILE_M, 1] f32 scratch running mean-path dot accumulator
    max_ref: [TILE_M, H] scratch     running max over layers (input dtype, exact)
    """
    l = pl.program_id(1)

    x = hs_ref[0]                 # [TILE_M, H], no upcast
    w_mean = w_ref[:, 0:1]        # [H, 1]

    # Mean path: fold the layer-sum into a per-layer N=1 matmul (the MXU is otherwise
    # idle here), so no [TILE_M, H] f32 running-sum slab is needed.
    dot_mean = jnp.dot(x, w_mean, preferred_element_type=jnp.float32)  # [TILE_M, 1]

    @pl.when(l == 0)
    def _first():
        acc_ref[...] = dot_mean
        max_ref[...] = x

    @pl.when(l > 0)
    def _rest():
        acc_ref[...] = acc_ref[...] + dot_mean
        max_ref[...] = jnp.maximum(max_ref[...], x)

    @pl.when(l == pl.num_programs(1) - 1)
    def _finalize():
        w_max = w_ref[:, 1:2]     # [H, 1]
        dot_max = jnp.dot(max_ref[...], w_max, preferred_element_type=jnp.float32)
        out_ref[...] = acc_ref[...] * inv_num_layers + dot_max + b_ref[0, 0]


def label_head(hidden_states, fc_weight, fc_bias, *, tile_m=2048):
    """hidden_states: [L, B, S, H]; fc_weight: [1, 2H]; fc_bias: [1].

    Returns label_logits of shape [B, S] (f32).
    """
    L, B, S, H = hidden_states.shape
    M = B * S

    # Merging (B, S) -> M is layout-free; no cast, no pad (no extra HBM passes).
    hs_flat = hidden_states.reshape(L, M, H)

    # Row-tile size: multiple of 8 (sublanes); cap so at least 2 tiles exist when the
    # problem is big enough (lets the "parallel" axis use both TensorCores on v7x).
    tile_m = min(tile_m, _round_up(M, 8))
    if M > tile_m:
        tile_m = min(tile_m, _round_up(_cdiv(M, 2), 8))
    grid_m = _cdiv(M, tile_m)

    # PyTorch Linear(2H, 1) weight layout is [1, 2H]:
    #   logits = mean @ W[:, :H].T + max @ W[:, H:].T + b
    # Pack as [H, 2] columns (col 0 -> mean path, col 1 -> max path); cast to the
    # hidden-state dtype so the in-kernel dots don't force a full-slab upcast.
    w_cols = fc_weight.reshape(2, H).T.astype(hs_flat.dtype)        # [H, 2]
    b = fc_bias.astype(jnp.float32).reshape(1, 1)

    # VMEM budget: 2 pipelined input buffers + 1 max scratch of [tile_m, H] + tiny acc.
    itemsize = jnp.dtype(hs_flat.dtype).itemsize
    block_bytes = tile_m * H * itemsize
    vmem_limit = int(min(max(32 << 20, 3 * block_bytes + (6 << 20)), 56 << 20))

    out = pl.pallas_call(
        functools.partial(_label_head_kernel, inv_num_layers=1.0 / L),
        out_shape=jax.ShapeDtypeStruct((grid_m * tile_m, 1), jnp.float32),
        grid_spec=pltpu.PrefetchScalarGridSpec(
            num_scalar_prefetch=0,
            grid=(grid_m, L),
            in_specs=[
                # one layer slab of the current M tile per grid step
                pl.BlockSpec((1, tile_m, H), lambda i, l: (l, i, 0)),
                # weights / bias stay resident across the whole grid
                pl.BlockSpec((H, 2), lambda i, l: (0, 0)),
                pl.BlockSpec((1, 1), lambda i, l: (0, 0),
                             memory_space=pltpu.SMEM),
            ],
            out_specs=pl.BlockSpec((tile_m, 1), lambda i, l: (i, 0)),
            scratch_shapes=[
                pltpu.VMEM((tile_m, 1), jnp.float32),      # mean-path dot accumulator
                pltpu.VMEM((tile_m, H), hs_flat.dtype),    # running layer max
            ],
        ),
        compiler_params=pltpu.CompilerParams(
            # M tiles are independent (megacore); L is a reduction axis.
            dimension_semantics=("parallel", "arbitrary"),
            vmem_limit_bytes=vmem_limit,
        ),
    )(hs_flat, w_cols, b)

    return out[:M, 0].reshape(B, S)


def nlp_model_label_forward(input_ids, attention_mask, params):
    """Mirrors NLP_model_label.forward (eval mode).

    Returns {'label_logits': [B, S], 'output_mask': [B, S]}.
    """
    emb_table = params["emb_table"]          # [vocab, H]
    layer_scale = params["layer_scale"]      # [L]
    layer_shift = params["layer_shift"]      # [L]
    fc_weight = params["fc_weight"]          # [1, 2H]
    fc_bias = params["fc_bias"]              # [1]

    # --- synthetic deterministic "backbone": per-layer hidden states [L, B, S, H] ---
    # TODO(synk): replace with a real DeBERTa encoder; here hs[l] = tanh(scale_l*emb + shift_l).
    emb = emb_table[input_ids]                                      # [B, S, H]
    hs = jnp.tanh(
        layer_scale[:, None, None, None] * emb[None, ...]
        + layer_shift[:, None, None, None]
    )                                                               # [L, B, S, H]

    label_logits = label_head(hs, fc_weight, fc_bias)               # [B, S]
    return {"label_logits": label_logits, "output_mask": attention_mask}


def _reference_label_head(hs, fc_weight, fc_bias):
    hs_mean = hs.mean(axis=0)
    hs_max = hs.max(axis=0)
    cat = jnp.concatenate([hs_mean, hs_max], axis=-1)               # [B, S, 2H]
    return (cat @ fc_weight.T + fc_bias)[..., 0]                    # [B, S]


if __name__ == "__main__":
    # Small, deberta-base-like shapes: 12 layers, batch=2, seq=8, hidden=32.
    L, B, S, H = 12, 2, 8, 32
    VOCAB = 100

    key = jax.random.PRNGKey(0)
    k_ids, k_emb, k_scale, k_shift, k_w, k_b = jax.random.split(key, 6)

    input_ids = jax.random.randint(k_ids, (B, S), 0, VOCAB, dtype=jnp.int32)
    attention_mask = jnp.ones((B, S), dtype=jnp.int32)

    params = {
        "emb_table": jax.random.normal(k_emb, (VOCAB, H), dtype=jnp.float32) * 0.1,
        "layer_scale": 1.0 + 0.05 * jax.random.normal(k_scale, (L,), dtype=jnp.float32),
        "layer_shift": 0.02 * jax.random.normal(k_shift, (L,), dtype=jnp.float32),
        # nn.Linear(2H, 1): weight [1, 2H], bias [1]
        "fc_weight": jax.random.normal(k_w, (1, 2 * H), dtype=jnp.float32)
        * (1.0 / jnp.sqrt(2.0 * H)),
        "fc_bias": jax.random.normal(k_b, (1,), dtype=jnp.float32) * 0.01,
    }

    out = nlp_model_label_forward(input_ids, attention_mask, params)
    jax.block_until_ready(out["label_logits"])
    jax.block_until_ready(out["output_mask"])

    assert out["label_logits"].shape == (B, S)
    assert out["output_mask"].shape == (B, S)

    # Numerical check against a plain-JAX reference of the head.
    emb = params["emb_table"][input_ids]
    hs = jnp.tanh(
        params["layer_scale"][:, None, None, None] * emb[None, ...]
        + params["layer_shift"][:, None, None, None]
    )
    ref = _reference_label_head(hs, params["fc_weight"], params["fc_bias"])
    assert jnp.allclose(out["label_logits"], ref, atol=1e-2, rtol=1e-2)

    print("KERNEL_OK")
</pallas_src>

<mosaic_0001>
module attributes {stable_mosaic.version = 11 : i64} {
  func.func @_label_head_kernel(%arg0: i32, %arg1: i32, %arg2: memref<1x16x32xf32, #tpu.memory_space<vmem>>, %arg3: memref<32x2xf32, #tpu.memory_space<vmem>>, %arg4: memref<1x1xf32, #tpu.memory_space<smem>>, %arg5: memref<16x1xf32, #tpu.memory_space<vmem>>, %arg6: memref<16x1xf32, #tpu.memory_space<vmem>>, %arg7: memref<16x32xf32, #tpu.memory_space<vmem>>) attributes {dimension_semantics = [#tpu.dimension_semantics<parallel>, #tpu.dimension_semantics<arbitrary>], iteration_bounds = array<i64: 1, 12>, scalar_prefetch = 0 : i64, scratch_operands = 2 : i64, tpu.core_type = #tpu.core_type<tc>, window_params = [{transform_indices = @transform_0, window_bounds = array<i64: 1, 16, 32>}, {pipeline_mode = #tpu.pipeline_mode<synchronous>, transform_indices = @transform_1, window_bounds = array<i64: 32, 2>}, {transform_indices = @transform_2, window_bounds = array<i64: 1, 1>}, {transform_indices = @transform_3, window_bounds = array<i64: 16, 1>}]} {
    %c0 = arith.constant 0 : index
    %c0_0 = arith.constant 0 : index
    %c0_1 = arith.constant 0 : index
    %0 = vector.load %arg2[%c0, %c0_0, %c0_1] : memref<1x16x32xf32, #tpu.memory_space<vmem>>, vector<1x16x32xf32>
    %1 = vector.shape_cast %0 : vector<1x16x32xf32> to vector<16x32xf32>
    %c0_2 = arith.constant 0 : index
    %c0_3 = arith.constant 0 : index
    %2 = vector.load %arg3[%c0_2, %c0_3] : memref<32x2xf32, #tpu.memory_space<vmem>>, vector<32x1xf32>
    %cst = arith.constant dense<0.000000e+00> : vector<16x1xf32>
    %3 = tpu.matmul %1, %2, %cst {dimension_numbers = #tpu.dot_dimension_numbers<[1], [0], [0], [1], [0, 0, 1, 1], [], []>} : vector<16x32xf32>, vector<32x1xf32>, vector<16x1xf32> -> vector<16x1xf32>
    %c0_i32 = arith.constant 0 : i32
    %4 = arith.cmpi eq, %arg1, %c0_i32 : i32
    %5 = arith.extui %4 : i1 to i32
    %c0_i32_4 = arith.constant 0 : i32
    %6 = arith.cmpi ne, %5, %c0_i32_4 : i32
    scf.if %6 {
      %c0_8 = arith.constant 0 : index
      %c0_9 = arith.constant 0 : index
      %13 = vector.load %arg6[%c0_8, %c0_9] : memref<16x1xf32, #tpu.memory_space<vmem>>, vector<16x1xf32>
      tpu.vector_store %arg6[%c0_8, %c0_9], %3 {strides = array<i32>} : memref<16x1xf32, #tpu.memory_space<vmem>>, vector<16x1xf32>,
      %c0_10 = arith.constant 0 : index
      %c0_11 = arith.constant 0 : index
      %14 = vector.load %arg7[%c0_10, %c0_11] : memref<16x32xf32, #tpu.memory_space<vmem>>, vector<16x32xf32>
      tpu.vector_store %arg7[%c0_10, %c0_11], %1 {strides = array<i32>} : memref<16x32xf32, #tpu.memory_space<vmem>>, vector<16x32xf32>,
    } else {
    }
    %c0_i32_5 = arith.constant 0 : i32
    %7 = arith.cmpi sgt, %arg1, %c0_i32_5 : i32
    %8 = arith.extui %7 : i1 to i32
    %c0_i32_6 = arith.constant 0 : i32
    %9 = arith.cmpi ne, %8, %c0_i32_6 : i32
    scf.if %9 {
      %c0_8 = arith.constant 0 : index
      %c0_9 = arith.constant 0 : index
      %13 = vector.load %arg6[%c0_8, %c0_9] : memref<16x1xf32, #tpu.memory_space<vmem>>, vector<16x1xf32>
      %14 = arith.addf %13, %3 : vector<16x1xf32>
      %c0_10 = arith.constant 0 : index
      %c0_11 = arith.constant 0 : index
      %15 = vector.load %arg6[%c0_10, %c0_11] : memref<16x1xf32, #tpu.memory_space<vmem>>, vector<16x1xf32>
      tpu.vector_store %arg6[%c0_10, %c0_11], %14 {strides = array<i32>} : memref<16x1xf32, #tpu.memory_space<vmem>>, vector<16x1xf32>,
      %c0_12 = arith.constant 0 : index
      %c0_13 = arith.constant 0 : index
      %16 = vector.load %arg7[%c0_12, %c0_13] : memref<16x32xf32, #tpu.memory_space<vmem>>, vector<16x32xf32>
      %17 = arith.maximumf %16, %1 : vector<16x32xf32>
      %c0_14 = arith.constant 0 : index
      %c0_15 = arith.constant 0 : index
      %18 = vector.load %arg7[%c0_14, %c0_15] : memref<16x32xf32, #tpu.memory_space<vmem>>, vector<16x32xf32>
      tpu.vector_store %arg7[%c0_14, %c0_15], %17 {strides = array<i32>} : memref<16x32xf32, #tpu.memory_space<vmem>>, vector<16x32xf32>,
    } else {
    }
    %c11_i32 = arith.constant 11 : i32
    %10 = arith.cmpi eq, %arg1, %c11_i32 : i32
    %11 = arith.extui %10 : i1 to i32
    %c0_i32_7 = arith.constant 0 : i32
    %12 = arith.cmpi ne, %11, %c0_i32_7 : i32
    scf.if %12 {
      %c0_8 = arith.constant 0 : index
      %c1 = arith.constant 1 : index
      %13 = vector.load %arg3[%c0_8, %c1] : memref<32x2xf32, #tpu.memory_space<vmem>>, vector<32x1xf32>
      %c0_9 = arith.constant 0 : index
      %c0_10 = arith.constant 0 : index
      %14 = vector.load %arg7[%c0_9, %c0_10] : memref<16x32xf32, #tpu.memory_space<vmem>>, vector<16x32xf32>
      %cst_11 = arith.constant dense<0.000000e+00> : vector<16x1xf32>
      %15 = tpu.matmul %14, %13, %cst_11 {dimension_numbers = #tpu.dot_dimension_numbers<[1], [0], [0], [1], [0, 0, 1, 1], [], []>} : vector<16x32xf32>, vector<32x1xf32>, vector<16x1xf32> -> vector<16x1xf32>
      %c0_12 = arith.constant 0 : index
      %c0_13 = arith.constant 0 : index
      %16 = vector.load %arg6[%c0_12, %c0_13] : memref<16x1xf32, #tpu.memory_space<vmem>>, vector<16x1xf32>
      %cst_14 = arith.constant 0.0833333358 : f32
      %17 = vector.broadcast %cst_14 : f32 to vector<16x1xf32>
      %18 = arith.mulf %16, %17 : vector<16x1xf32>
      %19 = arith.addf %18, %15 : vector<16x1xf32>
      %c0_15 = arith.constant 0 : index
      %c0_16 = arith.constant 0 : index
      %20 = memref.load %arg4[%c0_15, %c0_16] : memref<1x1xf32, #tpu.memory_space<smem>>
      %21 = vector.broadcast %20 : f32 to vector<16x1xf32>
      %22 = arith.addf %19, %21 : vector<16x1xf32>
      %c0_17 = arith.constant 0 : index
      %c0_18 = arith.constant 0 : index
      %23 = vector.load %arg5[%c0_17, %c0_18] : memref<16x1xf32, #tpu.memory_space<vmem>>, vector<16x1xf32>
      tpu.vector_store %arg5[%c0_17, %c0_18], %22 {strides = array<i32>} : memref<16x1xf32, #tpu.memory_space<vmem>>, vector<16x1xf32>,
    } else {
    }
    return
  }
  func.func @transform_0(%arg0: i32, %arg1: i32) -> (i32, i32, i32) {
    %c0_i32 = arith.constant 0 : i32
    %c0_i32_0 = arith.constant 0 : i32
    return %arg1, %arg0, %c0_i32 : i32, i32, i32
  }
  func.func @transform_1(%arg0: i32, %arg1: i32) -> (i32, i32) {
    %c0_i32 = arith.constant 0 : i32
    %c0_i32_0 = arith.constant 0 : i32
    %c0_i32_1 = arith.constant 0 : i32
    return %c0_i32, %c0_i32_0 : i32, i32
  }
  func.func @transform_2(%arg0: i32, %arg1: i32) -> (i32, i32) {
    %c0_i32 = arith.constant 0 : i32
    %c0_i32_0 = arith.constant 0 : i32
    %c0_i32_1 = arith.constant 0 : i32
    return %c0_i32, %c0_i32_0 : i32, i32
  }
  func.func @transform_3(%arg0: i32, %arg1: i32) -> (i32, i32) {
    %c0_i32 = arith.constant 0 : i32
    %c0_i32_0 = arith.constant 0 : i32
    return %arg0, %c0_i32 : i32, i32
  }
}

</mosaic_0001>

<bundles_post_ra>
// kernel: tpu_custom_call.1
= control target key start
LH: loop header
LB: loop body
LE: loop exit
PB: predicated region body
PF: predicated region fallthrough
CT: control target
= control target key end

     0   :  { %s871_s0 = inlined_call_operand.hbm [shape: f32[12,16,32], index: 0, kind: input, shape index: {}]   ;;  %s872_s1 = inlined_call_operand.vmem [shape: f32[32,2], index: 1, kind: input, shape index: {}]   ;;  %s873_s2 = inlined_call_operand.<no memory space> [shape: f32[1,1], index: 2, kind: input, shape index: {}]   ;;  %s874_s3 = inlined_call_operand.vmem [shape: f32[16,1], index: 3, kind: output, shape index: {}]  }
   0x1   :  { %8 = sst [smem:[#allocation4]] %s873_s2 }
   0x2   :  { %9 = vsyncpa [#allocation6], 0 }
   0x3   :  { %11 = vsyncpa [#allocation6 + $0x1], 0  ;;  %s739_s14 = smov 0   ;;  %s741_s15 = smov 0  }
   0x4   :  { %s743_s16 = smov 0   ;;  %s745_s17 = smov 0  }
   0x5   :  { %s747_s18 = smov 0   ;;  %s749_s19 = smov 0  }
   0x6 LB: > { %s520_s2 = sadd.s32 4294967295, %s710_s19   ;;  %s26_s20 = sadd.s32 1, %s706_s18  ;;  %s710_s19 = sphi %s749_s19, %s17_s19   ;;  %s706_s18 = sphi %s747_s18, %s882_s18   ;;  %s702_s17 = sphi %s745_s17, %s881_s17   ;;  %s698_s16 = sphi %s743_s16, %s880_s16   ;;  %s694_s15 = sphi %s741_s15, %s879_s15   ;;  %s690_s14 = sphi %s739_s14, %s878_s14  }
   0x7   : > { %p27_p0 = scmp.ge.s32.totalorder %s26_s20, 12  ;;  %s38_s21 = sadd.s32 1, %s698_s16 }
   0x8   : > { %p45_p1 = scmp.ne.s32.totalorder %s698_s16, %s694_s15  ;;  %p46_p2 = scmp.eq.s32.totalorder %s710_s19, 0 }
   0x9   : > { %s884_s20 = smov (%p27_p0, %s26_s20), 0  ;;  %p51_p4 = scmp.ne.s32.totalorder %s694_s15, %s690_s14 }
   0xa   : > { %p775_p3 = por %p46_p2, %p45_p1  ;;  %s33_s23 = ssub.s32 %s706_s18, %s884_s20 }
   0xb   : > { %p52_p5 = scmp.eq.s32.totalorder %s520_s2, 0  ;;  %p36_p6 = scmp.eq.s32.totalorder %s33_s23, 0 }
   0xc   : > { %p580_p8 = scmp.lt.s32.totalorder %s710_s19, 12  ;;  %s149_s26 = sand.u32 1, %s698_s16  }
   0xd   : > { %p782_p7 = por %p52_p5, %p51_p4  ;;  %s539_s27 = sshll.u32 %s706_s18, 8 }
   0xe   : > { %s788_s25 = scalar_select %p36_p6, %s698_s16, %s38_s21  }
   0xf   : > { %s523_s28 = sshll.u32 %s149_s26, 4  ;;  %s161_s4 = scalar_lea.hbm %s871_s0, %s539_s27 }
  0x10   : > { %s153_s5 = scalar_lea.vmem [#allocation5], %s523_s28  ;;  %p797_p9 = pnand %p580_p8, %p775_p3 }
  0x11   : > { %s162_s6 = sshll.u32 %s153_s5, 4  ;;  %s150_s8 = scalar_lea.sflag [#allocation6], %s149_s26  ;;  %s163_s6 = int_to_ptr.vmem [resolvable:$true] %s162_s6 }
  0x12   : > { %p634_p10 = pneg %p797_p9  ;;  %s645_s9 = scalar_lea.vmem %s163_s6, 256 }
  0x13   : > { %p646_p11 = scmp.ne.s32.totalorder %s163_s6, %s645_s9  ;;  %s712_s10 = smov [#allocation5]  }
  0x14   : > { %s650_s11 = sshll.u32 %s712_s10, 4  ;;  %s651_s11 = int_to_ptr.vmem [resolvable:$false] %s650_s11 }
  0x15   : > { %p648_p12 = pnand %p646_p11, %p634_p10  ;;  %s652_s12 = scalar_lea.vmem %s651_s11, 512 }
  0x16   : > { %p653_p0 = scmp.lt.s32.totalorder %s163_s6, %s651_s11  ;;  %p654_p1 = scmp.lt.s32.totalorder %s652_s12, %s645_s9 }
  0x17   : > { %p649_p13 = pneg %p648_p12 }
  0x18   : > { %p655_p2 = por %p654_p1, %p653_p0 }
  0x1a   : > { %p656_p3 = pnand %p655_p2, %p649_p13 }
  0x1c   : > { %659 = shalt.err (!%p656_p3)
}
  0x1d   : > { %s713_s13 = smov 128   ;;  %s714_s14 = smov 8  }
  0x1e   : > { %579 = dma.hbm_to_vmem [thread:$0]  (!%p797_p9), %s161_s4, 256, %s163_s6, %s150_s8, %s713_s13, %s713_s13, %s714_s14  }
  0x1f   : > { %p526_p4 = scmp.ge.s32.totalorder %s710_s19, 1  ;;  %p170_p5 = scmp.lt.s32.totalorder %s710_s19, 13 }
  0x21   : > { %p171_p6 = pnand %p526_p4, %p170_p5 }
  0x22   : > { %s176_s2 = sand.u32 (!%p171_p6), 1, %s694_s15  }
  0x23   : > { %174 = sbr.rel (%p171_p6) target bundleno = 592 (0x250), region = 32  ;;  %s527_s21 = sshll.u32 (!%p171_p6), %s176_s2, 4 }
  0x24   : > { %s177_s22 = scalar_lea.sflag (!%p171_p6), [#allocation6], %s176_s2  ;;  %s180_s23 = scalar_lea.vmem (!%p171_p6), [#allocation5], %s527_s21 }
  0x28   : > { %685 = dma.done.wait (%p782_p7), %s177_s22, 256  }
  0x29   : > { %687 = vsyncadd (%p782_p7), %s177_s22, 4294967040  ;;  %vm216_vm0 = vcmask 261120   ;;  %v215_v0 = vld [vmem:[%s872_s1 + $0x18] sm:$0xff]  ;;  %v214_v1 = vld [vmem:[%s872_s1 + $0x10] sm:$0xff]  ;;  %p530_p7 = scmp.ne.s32.totalorder %s702_s17, 0 }
  0x2a   : > { %552 = vmatprep.subr.mxu0 %v215_v0  ;;  %v210_v2 = vld [vmem:[%s180_s23] sm:$0xff]  ;;  %v213_v3 = vld [vmem:[%s872_s1 + $0x8] sm:$0xff] }
  0x2b   : > { %553 = vmatpush3.msra.mxu0 %v215_v0  ;;  %560 = vmatprep.mubr.msk.f32.mxu0 %vm216_vm0, %v210_v2  ;;  %v212_v4 = vld [vmem:[%s872_s1] sm:$0xff]  ;;  %v211_v5 = vld [vmem:[%s180_s23 + $0x8] sm:$0xff] }
  0x2c   : > { %554 = vmatprep.subr.mxu0 %v214_v1 }
  0x2d   : > { %555 = vmatpush3.msra.mxu0 %v214_v1 }
  0x2e   : > { %556 = vmatprep.subr.mxu0 %v213_v3 }
  0x2f   : > { %557 = vmatpush3.msra.mxu0 %v213_v3 }
  0x30   : > { %558 = vmatprep.subr.mxu0 %v212_v4 }
  0x31   : > { %559 = vmatpush3.msra.mxu0 %v212_v4 }
  0x32   : > { %561 = vmatmul.mubr.msk.f32.vlgmr.msra.gmra.mxu0 %vm216_vm0, %v211_v5 }
  0xf0   : > { %301 = sbr.rel (%p530_p7) target bundleno = 247 (0xf7), region = 40 }
  0xf2   : > { %v562_v6 = vpop.f32.mrf.mxu0 }
  0xf4   : > { %v289_v7 = vpop.f32.mrf.mxu0 }
  0xf5   : > { %vm302_vm1 = vcmask 7168   ;;  %305 = vst.msk [vmem:[#allocation3] sm:$0xff] %vm216_vm0, %v210_v2  ;;  %306 = vst.msk [vmem:[#allocation3 + $0x8] sm:$0xff] %vm216_vm0, %v211_v5 }
  0xf6   : > { %303 = vst.msk [vmem:[#allocation2] sm:$0xff] %vm302_vm1, %v289_v7  ;;  %304 = vst.msk [vmem:[#allocation2 + $0x8] sm:$0xff] %vm302_vm1, %v562_v6 }
  0xf7 PF: > { %p531_p8 = scmp.le.s32.totalorder %s702_s17, 0 }
  0xf9   : > { %310 = sbr.rel (%p531_p8) target bundleno = 259 (0x103), region = 44 }
  0xfe   : > { %v311_v8 = vld [vmem:[#allocation2] sm:$0xff]  ;;  %vm315_vm2 = vcmask 7168   ;;  %v312_v9 = vld [vmem:[#allocation2 + $0x8] sm:$0xff]  ;;  %v318_v10 = vld [vmem:[#allocation3] sm:$0xff] }
  0xff   : > { %v313_v11 = vadd.f32 %v311_v8, %v289_v7  ;;  %v314_v12 = vadd.f32 %v562_v6, %v312_v9  ;;  %v320_v13 = vmax.f32 %v318_v10, %v210_v2  ;;  %v319_v14 = vld [vmem:[#allocation3 + $0x8] sm:$0xff] }
 0x100   : > { %v321_v15 = vmax.f32 %v319_v14, %v211_v5 }
 0x101   : > { %316 = vst.msk [vmem:[#allocation2] sm:$0xff] %vm315_vm2, %v313_v11  ;;  %317 = vst.msk [vmem:[#allocation2 + $0x8] sm:$0xff] %vm315_vm2, %v314_v12 }
 0x102   : > { %322 = vst.msk [vmem:[#allocation3] sm:$0xff] %vm216_vm0, %v320_v13  ;;  %323 = vst.msk [vmem:[#allocation3 + $0x8] sm:$0xff] %vm216_vm0, %v321_v15 }
 0x103 PF: > { %p532_p9 = scmp.ne.s32.totalorder %s702_s17, 11 }
 0x104   : > { %s715_s10 = smov (!%p532_p9), 127   ;;  %s437_s17 = sld [smem:[#allocation4]] (!%p532_p9) }
 0x105   : > { %327 = sbr.rel (%p532_p9) target bundleno = 592 (0x250), region = 48 }
 0x10a   : > { %v331_v16 = vld [vmem:[%s872_s1 + $0x18] sm:$0xff]  ;;  %v329_v17 = vld [vmem:[%s872_s1 + $0x8] sm:$0xff]  ;;  %v332_v18 = vld [vmem:[#allocation3] sm:$0xff]  ;;  %v438_v31 = vstv %s437_s17  ;;  %vm441_vm3 = vcmask 7168  }
 0x10b   : > { %344 = vrot.lane.b32.xlu0 %v331_v16, %s715_s10  ;;  %340 = vrot.lane.b32.xlu1 %v329_v17, %s715_s10  ;;  %v330_v19 = vld [vmem:[%s872_s1 + $0x10] sm:$0xff]  ;;  %v328_v20 = vld [vmem:[%s872_s1] sm:$0xff]  ;;  %v333_v25 = vld [vmem:[#allocation3 + $0x8] sm:$0xff] }
 0x10c   : > { %571 = vmatprep.mubr.msk.f32.mxu0 %vm216_vm0, %v332_v18  ;;  %v432_v26 = vld [vmem:[#allocation2 + $0x8] sm:$0xff]  ;;  %v431_v27 = vld [vmem:[#allocation2] sm:$0xff] }
 0x10d   : > { %v434_v28 = vmul.f32 0.083333336, %v432_v26  ;;  %v433_v29 = vmul.f32 0.083333336, %v431_v27 }
 0x10f   : > { %342 = vrot.lane.b32.xlu0 %v330_v19, %s715_s10  ;;  %338 = vrot.lane.b32.xlu1 %v328_v20, %s715_s10 }
 0x17d   : > { %v345_v21 = vpop.permute.xlu0 %344  ;;  %v341_v22 = vpop.permute.xlu1 %340 }
 0x17e   : > { %563 = vmatprep.subr.mxu0 %v345_v21 }
 0x17f   : > { %564 = vmatpush3.msra.mxu0 %v345_v21 }
 0x181   : > { %v343_v23 = vpop.permute.xlu0 %342  ;;  %v339_v24 = vpop.permute.xlu1 %338 }
 0x182   : > { %565 = vmatprep.subr.mxu0 %v343_v23 }
 0x183   : > { %566 = vmatpush3.msra.mxu0 %v343_v23 }
 0x184   : > { %567 = vmatprep.subr.mxu0 %v341_v22 }
 0x185   : > { %568 = vmatpush3.msra.mxu0 %v341_v22 }
 0x186   : > { %569 = vmatprep.subr.mxu0 %v339_v24 }
 0x187   : > { %570 = vmatpush3.msra.mxu0 %v339_v24 }
 0x188   : > { %572 = vmatmul.mubr.msk.f32.vlgmr.msra.gmra.mxu0 %vm216_vm0, %v333_v25 }
 0x248   : > { %v573_v30 = vpop.f32.mrf.mxu0 }
 0x249   : > { %v436_v32 = vadd.f32 %v573_v30, %v434_v28 }
 0x24a   : > { %v422_v33 = vpop.f32.mrf.mxu0 }
 0x24b   : > { %v440_v34 = vadd.f32 %v438_v31, %v436_v32  ;;  %v435_v35 = vadd.f32 %v433_v29, %v422_v33 }
 0x24d   : > { %443 = vst.msk [vmem:[%s874_s3 + $0x8] sm:$0xff] %vm441_vm3, %v440_v34  ;;  %v439_v36 = vadd.f32 %v438_v31, %v435_v35 }
 0x24f   : > { %442 = vst.msk [vmem:[%s874_s3] sm:$0xff] %vm441_vm3, %v439_v36 }
 0x250 PF: > { %s17_s19 = sadd.s32 1, %s710_s19   ;;  %s878_s14 = smov %s694_s15 }
 0x251   : > { %p14_p10 = scmp.ge.s32.totalorder %s17_s19, 14   ;;  %s879_s15 = smov %s698_s16 }
 0x252   : > { %s880_s16 = smov %s788_s25  ;;  %s881_s17 = smov %s706_s18 }
 0x253   : > { %s882_s18 = smov %s884_s20  ;;  %16 = sbr.rel (!%p14_p10) target bundleno = 6 (0x6), region = 84 }
 0x258   :  { %466 = vsyncpa [#allocation6], 1 }
 0x259   :  { %468 = vsyncpa [#allocation6 + $0x1], 1 }

</bundles_post_ra>
